<compile_context>
chip_gen: v7x
topology: tpu7x:2x2x1
jax: 0.10.0
libtpu: 0.0.40
codegen_flags: <defaults>
</compile_context>

<pallas_src>
import jax
import jax.numpy as jnp
from jax.experimental import pallas as pl
from jax.experimental.pallas import tpu as pltpu

LANES = 128            # lane width (last dim of every vreg)
MAX_TILE_ROWS = 2048   # multiple of 32 -> native tiling for f32/bf16/int8 inputs
NCORES = 2             # leading "parallel" axis for v7x megacore sharding


def _rmse_partial_kernel(yhat_ref, y_ref, out_ref):
    """Accumulate sum((yhat - y)^2) over this core's tiles into an (8,128) f32 block."""
    i = pl.program_id(1)  # reduction axis ("arbitrary")

    @pl.when(i == 0)
    def _():
        out_ref[...] = jnp.zeros_like(out_ref)

    d = yhat_ref[...].astype(jnp.float32) - y_ref[...].astype(jnp.float32)
    sq = d * d                                   # (tile_rows, 128)
    tr = sq.shape[0]
    # Reduce only down to one vreg per step: (tr,128)->(tr//8,8,128)->sum(axis=0).
    # Layout-preserving reshape + a chain of full-vreg VPU adds (no XLU/scalar path).
    out_ref[...] += jnp.sum(sq.reshape(tr // 8, 8, LANES), axis=0)


def rmse_loss(y_hat, y):
    """sqrt(mean((y_hat - y)^2)) -> float32 scalar."""
    assert y_hat.shape == y.shape, "shapes must match (MSELoss default path)"
    n_total = y_hat.size

    yh = jnp.ravel(y_hat)
    yy = jnp.ravel(y)

    rows_total = n_total // LANES
    tile_rows = min(MAX_TILE_ROWS, (rows_total // 8) * 8)

    if tile_rows == 0:
        # Too small to form even one (8,128) tile: pure JAX fallback.
        d = yh.astype(jnp.float32) - yy.astype(jnp.float32)
        return jnp.sqrt(jnp.sum(d * d) / jnp.float32(n_total))

    num_tiles = rows_total // tile_rows
    nc = NCORES if num_tiles >= NCORES else 1
    tiles_per_core = num_tiles // nc
    main_rows = nc * tiles_per_core * tile_rows
    main_elems = main_rows * LANES

    # Tile-aligned prefix goes through the kernel. When n_total is already
    # aligned (common case, and the demo) this is a free reshape — no pad copy.
    yh_main = yh[:main_elems].reshape(main_rows, LANES)
    yy_main = yy[:main_elems].reshape(main_rows, LANES)

    in_map = lambda c, i: (c * tiles_per_core + i, 0)

    partials = pl.pallas_call(
        _rmse_partial_kernel,
        out_shape=jax.ShapeDtypeStruct((nc * 8, LANES), jnp.float32),
        grid_spec=pltpu.PrefetchScalarGridSpec(
            num_scalar_prefetch=0,
            grid=(nc, tiles_per_core),
            in_specs=[
                pl.BlockSpec((tile_rows, LANES), in_map),
                pl.BlockSpec((tile_rows, LANES), in_map),
            ],
            # Lane-dense (8,128) partial-sum block per core; acts as the accumulator.
            out_specs=pl.BlockSpec((8, LANES), lambda c, i: (c, 0)),
        ),
        compiler_params=pltpu.CompilerParams(
            dimension_semantics=("parallel", "arbitrary"),
        ),
    )(yh_main, yy_main)

    total = jnp.sum(partials)

    # Tail (everything past the tile-aligned prefix; bounded by ~nc*tile_rows*128
    # elements): summed in plain JAX — negligible cost, avoids any padding.
    tail = n_total - main_elems
    if tail:
        dt = yh[main_elems:].astype(jnp.float32) - yy[main_elems:].astype(jnp.float32)
        total = total + jnp.sum(dt * dt)

    return jnp.sqrt(total / jnp.float32(n_total))


if __name__ == "__main__":
    rmse = jax.jit(rmse_loss)

    key = jax.random.PRNGKey(0)
    k1, k2, k3, k4 = jax.random.split(key, 4)

    # Primary check: small NCHW shape implied by the module's usage.
    shape = (2, 4, 16, 16)
    y_hat = jax.random.normal(k1, shape, dtype=jnp.float32)
    y = jax.random.normal(k2, shape, dtype=jnp.float32)
    result = jax.block_until_ready(rmse(y_hat, y))
    ref = jnp.sqrt(jnp.mean((y_hat - y) ** 2))
    assert jnp.allclose(result, ref, rtol=1e-5, atol=1e-6), (result, ref)

    # Sanity check on a non-tile-aligned shape (exercises the JAX tail path).
    shape2 = (3, 5, 7, 11)
    a = jax.random.normal(k3, shape2, dtype=jnp.float32)
    b = jax.random.normal(k4, shape2, dtype=jnp.float32)
    r2 = jax.block_until_ready(rmse(a, b))
    ref2 = jnp.sqrt(jnp.mean((a - b) ** 2))
    assert jnp.allclose(r2, ref2, rtol=1e-5, atol=1e-6), (r2, ref2)

    print("KERNEL_OK")
</pallas_src>

<mosaic_0001>
module attributes {stable_mosaic.version = 11 : i64} {
  func.func @_rmse_partial_kernel(%arg0: i32, %arg1: i32, %arg2: memref<16x128xf32, #tpu.memory_space<vmem>>, %arg3: memref<16x128xf32, #tpu.memory_space<vmem>>, %arg4: memref<8x128xf32, #tpu.memory_space<vmem>>) attributes {dimension_semantics = [#tpu.dimension_semantics<parallel>, #tpu.dimension_semantics<arbitrary>], iteration_bounds = array<i64: 1, 1>, scalar_prefetch = 0 : i64, scratch_operands = 0 : i64, tpu.core_type = #tpu.core_type<tc>, window_params = [{transform_indices = @transform_0, window_bounds = array<i64: 16, 128>}, {transform_indices = @transform_1, window_bounds = array<i64: 16, 128>}, {transform_indices = @transform_2, window_bounds = array<i64: 8, 128>}]} {
    %c0_i32 = arith.constant 0 : i32
    %0 = arith.cmpi eq, %arg1, %c0_i32 : i32
    %1 = arith.extui %0 : i1 to i32
    %c0_i32_0 = arith.constant 0 : i32
    %2 = arith.cmpi ne, %1, %c0_i32_0 : i32
    scf.if %2 {
      %cst_8 = arith.constant 0.000000e+00 : f32
      %12 = vector.broadcast %cst_8 : f32 to vector<8x128xf32>
      %c0_9 = arith.constant 0 : index
      %c0_10 = arith.constant 0 : index
      %13 = vector.load %arg4[%c0_9, %c0_10] : memref<8x128xf32, #tpu.memory_space<vmem>>, vector<8x128xf32>
      tpu.vector_store %arg4[%c0_9, %c0_10], %12 {strides = array<i32>} : memref<8x128xf32, #tpu.memory_space<vmem>>, vector<8x128xf32>,
    } else {
    }
    %c0 = arith.constant 0 : index
    %c0_1 = arith.constant 0 : index
    %3 = vector.load %arg2[%c0, %c0_1] : memref<16x128xf32, #tpu.memory_space<vmem>>, vector<16x128xf32>
    %c0_2 = arith.constant 0 : index
    %c0_3 = arith.constant 0 : index
    %4 = vector.load %arg3[%c0_2, %c0_3] : memref<16x128xf32, #tpu.memory_space<vmem>>, vector<16x128xf32>
    %5 = arith.subf %3, %4 : vector<16x128xf32>
    %6 = arith.mulf %5, %5 : vector<16x128xf32>
    %c0_4 = arith.constant 0 : index
    %c0_5 = arith.constant 0 : index
    %7 = vector.load %arg4[%c0_4, %c0_5] : memref<8x128xf32, #tpu.memory_space<vmem>>, vector<8x128xf32>
    %8 = vector.shape_cast %6 : vector<16x128xf32> to vector<2x8x128xf32>
    %cst = arith.constant dense<0.000000e+00> : vector<8x128xf32>
    %9 = vector.multi_reduction <add>, %8, %cst [0] : vector<2x8x128xf32> to vector<8x128xf32>
    %10 = arith.addf %7, %9 : vector<8x128xf32>
    %c0_6 = arith.constant 0 : index
    %c0_7 = arith.constant 0 : index
    %11 = vector.load %arg4[%c0_6, %c0_7] : memref<8x128xf32, #tpu.memory_space<vmem>>, vector<8x128xf32>
    tpu.vector_store %arg4[%c0_6, %c0_7], %10 {strides = array<i32>} : memref<8x128xf32, #tpu.memory_space<vmem>>, vector<8x128xf32>,
    return
  }
  func.func @transform_0(%arg0: i32, %arg1: i32) -> (i32, i32) {
    %c1_i32 = arith.constant 1 : i32
    %0 = arith.muli %arg0, %c1_i32 : i32
    %1 = arith.addi %0, %arg1 : i32
    %c0_i32 = arith.constant 0 : i32
    %c0_i32_0 = arith.constant 0 : i32
    return %1, %c0_i32 : i32, i32
  }
  func.func @transform_1(%arg0: i32, %arg1: i32) -> (i32, i32) {
    %c1_i32 = arith.constant 1 : i32
    %0 = arith.muli %arg0, %c1_i32 : i32
    %1 = arith.addi %0, %arg1 : i32
    %c0_i32 = arith.constant 0 : i32
    %c0_i32_0 = arith.constant 0 : i32
    return %1, %c0_i32 : i32, i32
  }
  func.func @transform_2(%arg0: i32, %arg1: i32) -> (i32, i32) {
    %c0_i32 = arith.constant 0 : i32
    %c0_i32_0 = arith.constant 0 : i32
    return %arg0, %c0_i32 : i32, i32
  }
}

</mosaic_0001>

<bundles_post_ra>
// kernel: rmse_loss.1
= control target key start
LH: loop header
LB: loop body
LE: loop exit
PB: predicated region body
PF: predicated region fallthrough
CT: control target
= control target key end

     0   :  { %s119_s0 = inlined_call_operand.vmem [shape: f32[16,128], index: 0, kind: input, shape index: {}]   ;;  %s120_s1 = inlined_call_operand.vmem [shape: f32[16,128], index: 1, kind: input, shape index: {}]   ;;  %s121_s2 = inlined_call_operand.vmem [shape: f32[8,128], index: 2, kind: output, shape index: {}]  }
   0x1   :  { %v60_v0 = vld [vmem:[%s119_s0] sm:$0xff]  ;;  %v61_v1 = vld [vmem:[%s119_s0 + $0x8] sm:$0xff] }
   0x2   :  { %v62_v2 = vld [vmem:[%s120_s1] sm:$0xff]  ;;  %v63_v3 = vld [vmem:[%s120_s1 + $0x8] sm:$0xff] }
   0x3   :  { %v64_v4 = vsub.f32 %v60_v0, %v62_v2  ;;  %v65_v5 = vsub.f32 %v61_v1, %v63_v3 }
   0x5   :  { %v66_v6 = vmul.f32 %v64_v4, %v64_v4  ;;  %v67_v7 = vmul.f32 %v65_v5, %v65_v5 }
   0x7   :  { %v69_v8 = vadd.f32 %v67_v7, %v66_v6 }
   0x9   :  { %71 = vst [vmem:[%s121_s2] sm:$0xff] %v69_v8 }

</bundles_post_ra>
